<compile_context>
chip_gen: v7x
topology: tpu7x:2x2x1
jax: 0.10.0
libtpu: 0.0.40
codegen_flags: <defaults>
</compile_context>

<pallas_src>
import math

import jax
import jax.numpy as jnp
from jax.experimental import pallas as pl
from jax.experimental.pallas import tpu as pltpu


def _feature_agg_kernel(x_ref, w_ref, b_ref, o_ref):
    # x_ref: (TB, S, D) block of the input, in its native dtype
    # w_ref: (D, 1) linear weight, pre-scaled by 1/sqrt(d_embed)
    # b_ref: (1,) f32 bias in SMEM, pre-scaled by 1/sqrt(d_embed)
    # o_ref: (TB, D) output block
    x = x_ref[...]                                        # (TB, S, D)
    w = w_ref[...]                                        # (D, 1)
    bias = b_ref[0]                                       # f32 scalar (SMEM)

    # scores on the MXU with f32 accumulation -> lane-sparse (TB, S, 1)
    scores = jnp.einsum(
        "tsd,dq->tsq", x, w, preferred_element_type=jnp.float32
    )

    # Single relayout to a lane-dense row; everything downstream stays dense.
    s_row = jnp.swapaxes(scores, 1, 2) + bias             # (TB, 1, S) f32

    # Numerically stable softmax over the sequence (lane) axis with the
    # 1/denominator deferred to after the weighted sum.
    m = jnp.max(s_row, axis=-1, keepdims=True)            # (TB, 1, 1)
    e = jnp.exp(s_row - m)                                # (TB, 1, S)
    denom = jnp.sum(e, axis=-1, keepdims=True)            # (TB, 1, 1)

    # Weighted sum over S on the MXU: batched (1, S) @ (S, D) -> (TB, 1, D).
    acc = jnp.einsum(
        "tqs,tsd->tqd", e.astype(x.dtype), x,
        preferred_element_type=jnp.float32
    )                                                     # (TB, 1, D) f32

    out = acc * pl.reciprocal(denom)                      # exact recip in f32
    o_ref[...] = out[:, 0, :].astype(o_ref.dtype)


def _round_up(v, m):
    return -(-v // m) * m


def _per_row_vmem_bytes(seq, d_embed, itemsize):
    """Approx VMEM bytes per batch row in one grid step: double-buffered I/O
    blocks plus the lane/sublane-padded f32 temporaries the kernel creates."""
    sub, lane = 8, 128
    x_bytes = 2 * seq * d_embed * itemsize                 # x, double-buffered
    o_bytes = 2 * d_embed * itemsize                       # out, double-buffered
    scores = _round_up(seq, sub) * lane * 4                # (S, 1) f32 lane-padded
    rows = 3 * sub * _round_up(seq, lane) * 4              # (1, S) f32 temporaries
    acc = sub * _round_up(d_embed, lane) * (4 + itemsize)  # (1, D) acc f32 + cast
    return x_bytes + o_bytes + scores + rows + acc


def _vmem_budget_and_cap():
    """Per-generation block-sizing budget and scoped vmem_limit cap."""
    phys = None
    try:
        phys = getattr(pltpu.get_tpu_info(), "vmem_capacity_bytes", None)
    except Exception:
        phys = None
    if phys is not None and phys >= (100 << 20):
        # v5e / v6e: 128 MiB physical -> big tiles, fewer grid steps.
        return 72 << 20, 112 << 20
    # v7x (64 MiB physical) or unknown: stay conservative.
    return 20 << 20, 44 << 20


def _choose_block_b(batch, per_row_bytes, budget_bytes):
    """Largest batch tile whose per-step footprint fits the VMEM budget,
    while guaranteeing >=2 (target >=4) grid steps when batch > 8."""
    tb = max(1, int(budget_bytes) // int(per_row_bytes))
    tb = min(tb, batch)
    if batch > 8:
        target = max(8, _round_up(-(-batch // 4), 8))  # aim for >=4 steps
        tb = min(tb, target)
        tb = max(8, (tb // 8) * 8)                     # 8-sublane-aligned out block
        tb = min(tb, batch)
    return tb


def feature_aggregation(x, weight, bias, *, d_embed, block_b=None):
    """x: (B, S, D).  weight: (1, D), bias: (1,) -- torch nn.Linear layout."""
    B, S, D = x.shape
    assert D == d_embed
    scale = 1.0 / math.sqrt(d_embed)
    itemsize = jnp.dtype(x.dtype).itemsize

    # Fold the 1/sqrt(d_embed) scale into the tiny host-side params.
    w_t = (weight.T.astype(jnp.float32) * scale).astype(x.dtype)   # (D, 1)
    b_s = (bias.astype(jnp.float32) * scale).reshape(1)            # (1,) SMEM

    budget, cap = _vmem_budget_and_cap()
    per_row = _per_row_vmem_bytes(S, D, itemsize)
    tb = block_b if block_b is not None else _choose_block_b(B, per_row, budget)
    tb = min(tb, B)
    grid = (pl.cdiv(B, tb),)
    # TODO(synk): for very large S*D (>~400k f32 elems on v7x even at TB=8),
    # add a second ("arbitrary") grid axis over S with online-softmax scratch
    # (m/l/acc) so VMEM no longer scales with S.

    # Scoped VMEM limit covering the chosen per-step footprint with headroom,
    # capped per generation (well under 64 MiB on v7x, 128 MiB on v5e/v6e).
    vmem_limit = int(min(max(tb * per_row + (4 << 20), 16 << 20), cap))

    cost = pl.CostEstimate(
        flops=4 * B * S * D,
        transcendentals=B * S,
        bytes_accessed=(B * S * D + B * D + D) * itemsize,
    )

    out = pl.pallas_call(
        _feature_agg_kernel,
        out_shape=jax.ShapeDtypeStruct((B, D), x.dtype),
        grid_spec=pltpu.PrefetchScalarGridSpec(
            num_scalar_prefetch=0,
            grid=grid,
            in_specs=[
                pl.BlockSpec((tb, S, D), lambda i: (i, 0, 0)),
                pl.BlockSpec((D, 1), lambda i: (0, 0)),
                pl.BlockSpec(memory_space=pltpu.MemorySpace.SMEM),
            ],
            out_specs=pl.BlockSpec((tb, D), lambda i: (i, 0)),
        ),
        compiler_params=pltpu.CompilerParams(
            dimension_semantics=("parallel",),
            vmem_limit_bytes=vmem_limit,
        ),
        cost_estimate=cost,
    )(x, w_t, b_s)

    return out


def feature_aggregation_ref(x, weight, bias, *, d_embed):
    """Pure-JAX reference matching the PyTorch forward (eval mode)."""
    scale = 1.0 / math.sqrt(d_embed)
    scores = (jnp.einsum("bsd,d->bs", x, weight[0]) + bias[0]) * scale
    w = jax.nn.softmax(scores, axis=-1)
    return jnp.einsum("bs,bsd->bd", w, x)


if __name__ == "__main__":
    B, S, D = 2, 8, 32

    key = jax.random.PRNGKey(0)
    kx, kw, kb = jax.random.split(key, 3)

    x = jax.random.normal(kx, (B, S, D), dtype=jnp.float32)

    # nn.Linear(d_embed, 1) params; weight xavier_uniform_, bias default uniform
    xavier_bound = math.sqrt(6.0 / (D + 1))
    weight = jax.random.uniform(
        kw, (1, D), minval=-xavier_bound, maxval=xavier_bound, dtype=jnp.float32
    )
    bias_bound = 1.0 / math.sqrt(D)
    bias = jax.random.uniform(
        kb, (1,), minval=-bias_bound, maxval=bias_bound, dtype=jnp.float32
    )

    out = feature_aggregation(x, weight, bias, d_embed=D)
    out = jax.block_until_ready(out)

    ref = feature_aggregation_ref(x, weight, bias, d_embed=D)
    assert out.shape == (B, D)
    assert jnp.allclose(out, ref, atol=1e-3, rtol=1e-3), "mismatch vs reference"

    print("KERNEL_OK")
</pallas_src>

<mosaic_0001>
module attributes {stable_mosaic.version = 11 : i64} {
  func.func @_feature_agg_kernel(%arg0: i32, %arg1: memref<2x8x32xf32, #tpu.memory_space<vmem>>, %arg2: memref<32x1xf32, #tpu.memory_space<vmem>>, %arg3: memref<1xf32, #tpu.memory_space<smem>>, %arg4: memref<2x32xf32, #tpu.memory_space<vmem>>) attributes {dimension_semantics = [#tpu.dimension_semantics<parallel>], iteration_bounds = array<i64: 1>, scalar_prefetch = 0 : i64, scratch_operands = 0 : i64, tpu.core_type = #tpu.core_type<tc>, window_params = [{transform_indices = @transform_0, window_bounds = array<i64: 2, 8, 32>}, {pipeline_mode = #tpu.pipeline_mode<synchronous>, transform_indices = @transform_1, window_bounds = array<i64: 32, 1>}, {transform_indices = @transform_2, window_bounds = array<i64: 1>}, {transform_indices = @transform_3, window_bounds = array<i64: 2, 32>}]} {
    %c0 = arith.constant 0 : index
    %c0_0 = arith.constant 0 : index
    %c0_1 = arith.constant 0 : index
    %0 = vector.load %arg1[%c0, %c0_0, %c0_1] : memref<2x8x32xf32, #tpu.memory_space<vmem>>, vector<2x8x32xf32>
    %c0_2 = arith.constant 0 : index
    %c0_3 = arith.constant 0 : index
    %1 = vector.load %arg2[%c0_2, %c0_3] : memref<32x1xf32, #tpu.memory_space<vmem>>, vector<32x1xf32>
    %c0_4 = arith.constant 0 : index
    %2 = memref.load %arg3[%c0_4] : memref<1xf32, #tpu.memory_space<smem>>
    "tpu.trace_start"() <{level = 10 : i32, message = "tsd,dq->tsq"}> : () -> ()
    %cst = arith.constant dense<0.000000e+00> : vector<2x8x1xf32>
    %3 = tpu.matmul %0, %1, %cst {dimension_numbers = #tpu.dot_dimension_numbers<[2], [0], [0, 1], [1], [0, 0, 0, 1, 1, 1], [], []>} : vector<2x8x32xf32>, vector<32x1xf32>, vector<2x8x1xf32> -> vector<2x8x1xf32>
    "tpu.trace_stop"() : () -> ()
    %4 = tpu.transpose %3, [0, 2, 1] : vector<2x8x1xf32> -> vector<2x1x8xf32>
    %5 = vector.broadcast %2 : f32 to vector<2x1x8xf32>
    %6 = arith.addf %4, %5 : vector<2x1x8xf32>
    %cst_5 = arith.constant dense<0xFF800000> : vector<2x1xf32>
    %7 = vector.multi_reduction <maximumf>, %6, %cst_5 [2] : vector<2x1x8xf32> to vector<2x1xf32>
    %8 = vector.shape_cast %7 : vector<2x1xf32> to vector<2x1x1xf32>
    %9 = vector.broadcast %8 : vector<2x1x1xf32> to vector<2x1x8xf32>
    %10 = arith.subf %6, %9 : vector<2x1x8xf32>
    %11 = math.exp %10 : vector<2x1x8xf32>
    %cst_6 = arith.constant dense<0.000000e+00> : vector<2x1xf32>
    %12 = vector.multi_reduction <add>, %11, %cst_6 [2] : vector<2x1x8xf32> to vector<2x1xf32>
    %13 = vector.shape_cast %12 : vector<2x1xf32> to vector<2x1x1xf32>
    "tpu.trace_start"() <{level = 10 : i32, message = "tqs,tsd->tqd"}> : () -> ()
    %cst_7 = arith.constant dense<0.000000e+00> : vector<2x1x32xf32>
    %14 = tpu.matmul %11, %0, %cst_7 {dimension_numbers = #tpu.dot_dimension_numbers<[2], [1], [1], [2], [0, 0, 0, 1, 1, 2], [0], [0]>} : vector<2x1x8xf32>, vector<2x8x32xf32>, vector<2x1x32xf32> -> vector<2x1x32xf32>
    "tpu.trace_stop"() : () -> ()
    %15 = tpu.reciprocal %13 : vector<2x1x1xf32> -> vector<2x1x1xf32>
    %16 = vector.broadcast %15 : vector<2x1x1xf32> to vector<2x1x32xf32>
    %17 = arith.mulf %14, %16 : vector<2x1x32xf32>
    %18 = vector.shape_cast %17 : vector<2x1x32xf32> to vector<2x32xf32>
    %c0_8 = arith.constant 0 : index
    %c0_9 = arith.constant 0 : index
    %19 = vector.load %arg4[%c0_8, %c0_9] : memref<2x32xf32, #tpu.memory_space<vmem>>, vector<2x32xf32>
    tpu.vector_store %arg4[%c0_8, %c0_9], %18 {strides = array<i32>} : memref<2x32xf32, #tpu.memory_space<vmem>>, vector<2x32xf32>,
    return
  }
  func.func @transform_0(%arg0: i32) -> (i32, i32, i32) {
    %c0_i32 = arith.constant 0 : i32
    %c0_i32_0 = arith.constant 0 : i32
    %c0_i32_1 = arith.constant 0 : i32
    return %arg0, %c0_i32, %c0_i32_0 : i32, i32, i32
  }
  func.func @transform_1(%arg0: i32) -> (i32, i32) {
    %c0_i32 = arith.constant 0 : i32
    %c0_i32_0 = arith.constant 0 : i32
    %c0_i32_1 = arith.constant 0 : i32
    return %c0_i32, %c0_i32_0 : i32, i32
  }
  func.func @transform_2(%arg0: i32) -> i32 {
    %c0_i32 = arith.constant 0 : i32
    %c0_i32_0 = arith.constant 0 : i32
    return %c0_i32 : i32
  }
  func.func @transform_3(%arg0: i32) -> (i32, i32) {
    %c0_i32 = arith.constant 0 : i32
    %c0_i32_0 = arith.constant 0 : i32
    return %arg0, %c0_i32 : i32, i32
  }
}

</mosaic_0001>

<bundles_post_ra>
// kernel: tpu_custom_call.1
= control target key start
LH: loop header
LB: loop body
LE: loop exit
PB: predicated region body
PF: predicated region fallthrough
CT: control target
= control target key end

     0   :  { %vm23_vm0 = vcmask 261120   ;;  %s504_s0 = inlined_call_operand.vmem [shape: f32[2,8,32], index: 0, kind: input, shape index: {}]   ;;  %s505_s1 = inlined_call_operand.vmem [shape: f32[32,1], index: 1, kind: input, shape index: {}]   ;;  %s506_s2 = inlined_call_operand.<no memory space> [shape: f32[1], index: 2, kind: input, shape index: {}]   ;;  %s507_s3 = inlined_call_operand.hbm [shape: f32[2,32], index: 3, kind: output, shape index: {}]  }
   0x1   :  { %v18_v0 = vld [vmem:[%s505_s1] sm:$0xff]  ;;  %v19_v1 = vld [vmem:[%s505_s1 + $0x8] sm:$0xff]  ;;  %v20_v2 = vld [vmem:[%s505_s1 + $0x10] sm:$0xff] }
   0x2   :  { %v399_v3 = vpack.c.bf16 %v19_v1, %v18_v0  ;;  %v21_v4 = vld [vmem:[%s505_s1 + $0x18] sm:$0xff]  ;;  %v16_v5 = vld [vmem:[%s504_s0] sm:$0xff] }
   0x3   :  { %v403_v6 = vpack.c.bf16 %v21_v4, %v20_v2  ;;  %386 = vmatprep.mubr.msk.f32.mxu0 %vm23_vm0, %v16_v5 }
   0x4   :  { %9 = vsyncpa [#allocation4], 0  ;;  %400 = vmatprep.subr.bf16.mxu0 %v399_v3  ;;  %v17_v7 = vld [vmem:[%s504_s0 + $0x8] sm:$0xff]  ;;  %v169_v10 = vstv %s506_s2  ;;  %vm172_vm1 = vcmask 57344   ;;  %v442_v17 = vmov 0.0   ;;  %vm443_vm2 = vmmov 0  }
   0x5   :  { %402 = vmatpush3.bf16.msra.mxu0 %v399_v3  ;;  %389 = vmatprep.subr.mxu1 %v442_v17  ;;  %vm191_vm3 = vcmask 64512   ;;  %s444_s0 = smov [#allocation3]   ;;  %vm345_vm4 = vcmask 1041409   ;;  %vm348_vm5 = vcmask 254976  }
   0x6   :  { %404 = vmatprep.subr.bf16.mxu0 %v403_v6  ;;  %391 = vmatprep.mubr.msk.f32.mxu1 %vm443_vm2, %v442_v17  ;;  %s356_s2 = sshll.u32 %s444_s0, 4  ;;  %s357_s2 = int_to_ptr.vmem [resolvable:$true] %s356_s2 }
   0x7   :  { %390 = vmatpush3.msra.mxu1 %v16_v5  ;;  %s418_s25 = scalar_lea.vmem %s357_s2, 32  ;;  %p423_p1 = scmp.lt.s32.totalorder %s357_s2, %s357_s2 }
   0x8   :  { %394 = vmatprep.subr.mxu1 %v442_v17  ;;  %p419_p0 = scmp.ne.s32.totalorder %s357_s2, %s418_s25  ;;  %p424_p2 = scmp.lt.s32.totalorder %s418_s25, %s418_s25 }
   0x9   :  { %406 = vmatpush3.bf16.msra.mxu0 %v403_v6 }
   0xa   :  { %p425_p3 = por %p424_p2, %p423_p1 }
   0xc   :  { %387 = vmatmul.mubr.msk.f32.vlgmr.msra.gmra.mrb[0].mxu0 %vm23_vm0, %v17_v7  ;;  %p426_p4 = pnand %p425_p3, %p419_p0 }
  0xdf   :  { %v388_v8 = vpop.f32.mrb[0].mxu0 }
  0xe0   :  { %v96_v9 = vpop.f32.mrb[1].mxu0 }
  0xe1   :  { %105 = vxpose.xlu0.b32.start.end [1/1] (short) (narrow) %v96_v9, 8 }
  0xe5   :  { %137 = vxpose.xlu0.b32.start.end [1/1] (short) (narrow) %v388_v8, 8 }
 0x161   :  { %v121_v11 = vpop.trf.xlu0 }
 0x162   :  { %v170_v12 = vadd.f32 %v169_v10, %v121_v11 }
 0x164   :  { %v173_v13 = vsel %vm172_vm1, %v170_v12, -inf }
 0x165   :  { %174 = vmax.xlane.f32.xlu1 %v173_v13  ;;  %v153_v14 = vpop.trf.xlu0 }
 0x166   :  { %v171_v15 = vadd.f32 %v169_v10, %v153_v14 }
 0x168   :  { %v176_v16 = vsel %vm172_vm1, %v171_v15, -inf }
 0x169   :  { %177 = vmax.xlane.f32.xlu1 %v176_v16 }
 0x1f2   :  { %v175_v18 = vpop.xlane.xlu1 %174 }
 0x1f3   :  { %v179_v19 = vsub.f32 %v170_v12, %v175_v18 }
 0x1f5   :  { %v181_v20 = vmul.f32 1.442695, %v179_v19 }
 0x1f6   :  { %v178_v21 = vpop.xlane.xlu1 %177 }
 0x1f7   :  { %410 = vpow2.f32 %v181_v20  ;;  %v180_v22 = vsub.f32 %v171_v15, %v178_v21 }
 0x1f9   :  { %v183_v23 = vmul.f32 1.442695, %v180_v22 }
 0x1fb   :  { %412 = vpow2.f32 %v183_v23 }
 0x201   :  { %v411_v24 = vpop.eup %410 }
 0x202   :  { %392 = vmatmul.mubr.msk.f32.vlgmr.msra.gmra.mrb[0].mxu1 %vm191_vm3, %v411_v24  ;;  %v185_v25 = vsel %vm172_vm1, %v411_v24, 0.0 }
 0x203   :  { %395 = vmatpush3.msra.mxu1 %v17_v7  ;;  %186 = vadd.xlane.f32.xlu1 %v185_v25 }
 0x204   :  { %396 = vmatprep.mubr.msk.f32.mxu1 %vm443_vm2, %v442_v17 }
 0x205   :  { %v413_v26 = vpop.eup %412 }
 0x206   :  { %397 = vmatmul.mubr.msk.f32.vlgmr.msra.gmra.mrb[2].mxu1 %vm191_vm3, %v413_v26  ;;  %v188_v27 = vsel %vm172_vm1, %v413_v26, 0.0 }
 0x207   :  { %189 = vadd.xlane.f32.xlu0 %v188_v27 }
 0x290   :  { %v187_v29 = vpop.xlane.xlu1 %186 }
 0x294   :  { %v190_v28 = vpop.xlane.xlu0 %189 }
 0x295   :  { %414 = vrcp.f32 %v190_v28 }
 0x296   :  { %416 = vrcp.f32 %v187_v29 }
 0x29f   :  { %v415_v32 = vpop.eup %414 }
 0x2a0   :  { %v417_v36 = vpop.eup %416 }
 0x2d5   :  { %v261_v30 = vpop.f32.mrb[0].mxu1 }
 0x2d6   :  { %v393_v31 = vpop.f32.mrb[1].mxu1  ;;  %v340_v37 = vmul.f32 %v417_v36, %v261_v30 }
 0x2d9   :  { %v334_v33 = vpop.f32.mrb[2].mxu1 }
 0x2da   :  { %v341_v34 = vmul.f32 %v415_v32, %v334_v33  ;;  %v398_v35 = vpop.f32.mrb[3].mxu1 }
 0x2dc   :  { %v344_v38 = vrot.slane %v341_v34, 7 }
 0x2de   :  { %v346_v39 = vsel %vm345_vm4, %v344_v38, %v340_v37 }
 0x2df   :  { %349 = vst.msk [vmem:[#allocation3] sm:$0x3] %vm348_vm5, %v346_v39 }
 0x2e0   :  { %429 = shalt.err (!%p426_p4)
}
 0x2e1   :  { %s430_s28 = scalar_lea.hbm %s507_s3, 32 }
 0x2e2   :  { %p431_p5 = scmp.ne.s32.totalorder %s507_s3, %s430_s28  ;;  %p434_p6 = scmp.lt.u32.totalorder %s430_s28, %s507_s3 }
 0x2e4   :  { %p436_p7 = pnand %p434_p6, %p431_p5 }
 0x2e6   :  { %439 = shalt.err (!%p436_p7)
}
 0x2e7   :  { %359 = dma.vmem_to_hbm [thread:$0]  %s357_s2, 32, %s507_s3, [#allocation4]  }
 0x2e8   :  { %440 = dma.done.wait [#allocation4], 32  }
 0x2e9   :  { %441 = vsyncadd [#allocation4], 4294967264 }
 0x2ea   :  { %363 = vsyncpa [#allocation4], 1 }

</bundles_post_ra>
